<compile_context>
chip_gen: v5e
topology: v5e:2x2
jax: 0.10.0
libtpu: 0.0.40
codegen_flags: <defaults>
</compile_context>

<pallas_src>
import jax
import jax.numpy as jnp
from jax.experimental import pallas as pl
from jax.experimental.pallas import tpu as pltpu


def _make_flatten_kernel(n_rows: int, n_chunks: int):
    """Build a gridless kernel that copies (n_rows, flat) HBM->HBM in chunks."""
    # Static row partition (computed at trace time; chunks are contiguous).
    base = n_rows // n_chunks
    rem = n_rows % n_chunks
    starts, lens = [], []
    r = 0
    for c in range(n_chunks):
        ln = base + (1 if c < rem else 0)
        starts.append(r)
        lens.append(ln)
        r += ln

    def kernel(x_hbm, o_hbm, sem):
        # Direct HBM -> HBM DMA copy; no VMEM staging, no vld/vst pass.
        copies = []
        for c in range(n_chunks):
            cp = pltpu.make_async_copy(
                x_hbm.at[pl.ds(starts[c], lens[c]), :],
                o_hbm.at[pl.ds(starts[c], lens[c]), :],
                sem.at[c],
            )
            cp.start()
            copies.append(cp)
        for cp in copies:
            cp.wait()

    return kernel


def flatten(x: jax.Array) -> jax.Array:
    """Pallas equivalent of Flatten.forward: (N, ...) -> (N, prod(...))."""
    n = x.shape[0]
    flat = 1
    for d in x.shape[1:]:
        flat *= d

    # Row-major reshape outside the kernel (metadata-only for contiguous x);
    # matches torch .view(N, -1) exactly.  In real models this reshape alone
    # IS the op — the kernel below only materializes the result buffer.
    x2 = x.reshape(n, flat)

    # Up to 4 row chunks (each >= 1 row) so DMA issue overlaps; each chunk is
    # a contiguous HBM slab regardless of dtype or flat alignment.
    n_chunks = max(1, min(4, n))
    kernel = _make_flatten_kernel(n, n_chunks)

    return pl.pallas_call(
        kernel,
        out_shape=jax.ShapeDtypeStruct((n, flat), x.dtype),
        in_specs=[pl.BlockSpec(memory_space=pl.ANY)],
        out_specs=pl.BlockSpec(memory_space=pl.ANY),
        scratch_shapes=[pltpu.SemaphoreType.DMA((n_chunks,))],
    )(x2)


if __name__ == "__main__":
    key = jax.random.PRNGKey(0)
    # Small NCHW input consistent with a conv-style feature map.
    x = jax.random.normal(key, (2, 4, 16, 16), dtype=jnp.float32)

    y = flatten(x)
    y = jax.block_until_ready(y)

    # Reference: plain row-major reshape (same as torch .view(N, -1)).
    y_ref = x.reshape(x.shape[0], -1)

    assert y.shape == (2, 4 * 16 * 16), y.shape
    assert y.dtype == x.dtype
    assert jnp.array_equal(y, y_ref), "Pallas flatten mismatch vs reference"

    print("KERNEL_OK")
</pallas_src>

<mosaic_0001>
module attributes {stable_mosaic.version = 11 : i64} {
  func.func @kernel(%arg0: memref<2x1024xf32, #tpu.memory_space<any>>, %arg1: memref<2x1024xf32, #tpu.memory_space<any>>, %arg2: memref<2x!tpu.dma_semaphore, #tpu.memory_space<semaphore_mem>>) attributes {dimension_semantics = [], scalar_prefetch = 0 : i64, scratch_operands = 1 : i64, tpu.core_type = #tpu.core_type<tc>} {
    %c0_i32 = arith.constant 0 : i32
    %c0_i32_0 = arith.constant 0 : i32
    %c0_i32_1 = arith.constant 0 : i32
    %0 = tpu.memref_slice %arg0[%c0_i32_0, %c0_i32_1] : memref<2x1024xf32, #tpu.memory_space<any>> -> memref<1x1024xf32, #tpu.memory_space<any>>
    %c0_i32_2 = arith.constant 0 : i32
    %c0_i32_3 = arith.constant 0 : i32
    %1 = tpu.memref_slice %arg1[%c0_i32_2, %c0_i32_3] : memref<2x1024xf32, #tpu.memory_space<any>> -> memref<1x1024xf32, #tpu.memory_space<any>>
    %2 = tpu.memref_slice %arg2[%c0_i32] : memref<2x!tpu.dma_semaphore, #tpu.memory_space<semaphore_mem>> -> memref<1x!tpu.dma_semaphore, #tpu.memory_space<semaphore_mem>>
    %3 = tpu.memref_squeeze %2 : memref<1x!tpu.dma_semaphore, #tpu.memory_space<semaphore_mem>> -> memref<!tpu.dma_semaphore, #tpu.memory_space<semaphore_mem>>
    tpu.enqueue_dma source(%0 : memref<1x1024xf32, #tpu.memory_space<any>>) target(%1 : memref<1x1024xf32, #tpu.memory_space<any>>) target_semaphore(%3 : memref<!tpu.dma_semaphore, #tpu.memory_space<semaphore_mem>>)
    %c1_i32 = arith.constant 1 : i32
    %c1_i32_4 = arith.constant 1 : i32
    %c0_i32_5 = arith.constant 0 : i32
    %4 = tpu.memref_slice %arg0[%c1_i32_4, %c0_i32_5] : memref<2x1024xf32, #tpu.memory_space<any>> -> memref<1x1024xf32, #tpu.memory_space<any>>
    %c1_i32_6 = arith.constant 1 : i32
    %c0_i32_7 = arith.constant 0 : i32
    %5 = tpu.memref_slice %arg1[%c1_i32_6, %c0_i32_7] : memref<2x1024xf32, #tpu.memory_space<any>> -> memref<1x1024xf32, #tpu.memory_space<any>>
    %6 = tpu.memref_slice %arg2[%c1_i32] : memref<2x!tpu.dma_semaphore, #tpu.memory_space<semaphore_mem>> -> memref<1x!tpu.dma_semaphore, #tpu.memory_space<semaphore_mem>>
    %7 = tpu.memref_squeeze %6 : memref<1x!tpu.dma_semaphore, #tpu.memory_space<semaphore_mem>> -> memref<!tpu.dma_semaphore, #tpu.memory_space<semaphore_mem>>
    tpu.enqueue_dma source(%4 : memref<1x1024xf32, #tpu.memory_space<any>>) target(%5 : memref<1x1024xf32, #tpu.memory_space<any>>) target_semaphore(%7 : memref<!tpu.dma_semaphore, #tpu.memory_space<semaphore_mem>>)
    %c0_i32_8 = arith.constant 0 : i32
    %c0_i32_9 = arith.constant 0 : i32
    %c0_i32_10 = arith.constant 0 : i32
    %8 = tpu.memref_slice %arg0[%c0_i32_9, %c0_i32_10] : memref<2x1024xf32, #tpu.memory_space<any>> -> memref<1x1024xf32, #tpu.memory_space<any>>
    %c0_i32_11 = arith.constant 0 : i32
    %c0_i32_12 = arith.constant 0 : i32
    %9 = tpu.memref_slice %arg1[%c0_i32_11, %c0_i32_12] : memref<2x1024xf32, #tpu.memory_space<any>> -> memref<1x1024xf32, #tpu.memory_space<any>>
    %10 = tpu.memref_slice %arg2[%c0_i32_8] : memref<2x!tpu.dma_semaphore, #tpu.memory_space<semaphore_mem>> -> memref<1x!tpu.dma_semaphore, #tpu.memory_space<semaphore_mem>>
    %11 = tpu.memref_squeeze %10 : memref<1x!tpu.dma_semaphore, #tpu.memory_space<semaphore_mem>> -> memref<!tpu.dma_semaphore, #tpu.memory_space<semaphore_mem>>
    tpu.wait_dma2 semaphore(%11 : memref<!tpu.dma_semaphore, #tpu.memory_space<semaphore_mem>>) src(%8 : memref<1x1024xf32, #tpu.memory_space<any>>) dst(%9 : memref<1x1024xf32, #tpu.memory_space<any>>)
    %c1_i32_13 = arith.constant 1 : i32
    %c1_i32_14 = arith.constant 1 : i32
    %c0_i32_15 = arith.constant 0 : i32
    %12 = tpu.memref_slice %arg0[%c1_i32_14, %c0_i32_15] : memref<2x1024xf32, #tpu.memory_space<any>> -> memref<1x1024xf32, #tpu.memory_space<any>>
    %c1_i32_16 = arith.constant 1 : i32
    %c0_i32_17 = arith.constant 0 : i32
    %13 = tpu.memref_slice %arg1[%c1_i32_16, %c0_i32_17] : memref<2x1024xf32, #tpu.memory_space<any>> -> memref<1x1024xf32, #tpu.memory_space<any>>
    %14 = tpu.memref_slice %arg2[%c1_i32_13] : memref<2x!tpu.dma_semaphore, #tpu.memory_space<semaphore_mem>> -> memref<1x!tpu.dma_semaphore, #tpu.memory_space<semaphore_mem>>
    %15 = tpu.memref_squeeze %14 : memref<1x!tpu.dma_semaphore, #tpu.memory_space<semaphore_mem>> -> memref<!tpu.dma_semaphore, #tpu.memory_space<semaphore_mem>>
    tpu.wait_dma2 semaphore(%15 : memref<!tpu.dma_semaphore, #tpu.memory_space<semaphore_mem>>) src(%12 : memref<1x1024xf32, #tpu.memory_space<any>>) dst(%13 : memref<1x1024xf32, #tpu.memory_space<any>>)
    return
  }
}

</mosaic_0001>

<bundles_post_ra>
// kernel: tpu_custom_call.1
= control target key start
LH: loop header
LB: loop body
LE: loop exit
PB: predicated region body
PF: predicated region fallthrough
CT: control target
= control target key end

     0   :  { %s76_s12 = smov 32   ;;  %s77_s13 = smov 1   ;;  %s105_s0 = inlined_call_operand.hbm [shape: f32[2,1024], index: 0, kind: input, shape index: {}]   ;;  %s106_s1 = inlined_call_operand.hbm [shape: f32[2,1024], index: 1, kind: output, shape index: {}]  }
   0x1   :  { %s10_s8 = sshll.u32 %s105_s0, 4  ;;  %s12_s11 = sshll.u32 %s106_s1, 4  ;;  %s11_s8 = int_to_ptr.hbm [resolvable:$true] %s10_s8  ;;  %s13_s11 = int_to_ptr.hbm [resolvable:$true] %s12_s11 }
   0x2   :  { %17 = sst [smem:[#allocation4]] %s76_s12  ;;  %s78_s14 = smov [#allocation2]  }
   0x3   :  { %19 = sst [smem:[#allocation4 + $0x1]] %s76_s12  ;;  %s79_s15 = smov [#allocation3]  }
   0x4   :  { %21 = sst [smem:[#allocation4 + $0x2]] %s77_s13  ;;  %s80_s16 = smov 0  }
   0x5   :  { %23 = dma.general %s11_s8, 128, %s13_s11, %s78_s14, %s79_s15, [#allocation4], %s80_s16, 0  }
   0x6   :  { %38 = sst [smem:[#allocation6]] %s76_s12  ;;  %s24_s19 = scalar_lea.hbm %s105_s0, 1 }
   0x7   :  { %40 = sst [smem:[#allocation6 + $0x1]] %s76_s12  ;;  %s25_s22 = scalar_lea.hbm %s106_s1, 1 }
   0x8   :  { %42 = sst [smem:[#allocation6 + $0x2]] %s77_s13  ;;  %s31_s23 = sshll.u32 %s24_s19, 4  ;;  %s32_s23 = int_to_ptr.hbm [resolvable:$true] %s31_s23 }
   0x9   :  { %s33_s24 = sshll.u32 %s25_s22, 4  ;;  %s81_s25 = smov [#allocation2 + $0x1]   ;;  %s34_s24 = int_to_ptr.hbm [resolvable:$true] %s33_s24 }
   0xa   :  { %s82_s26 = smov [#allocation5]  }
   0xb   :  { %44 = dma.general %s32_s23, 128, %s34_s24, %s81_s25, %s82_s26, [#allocation6], %s80_s16, 0  }
   0xc   :  { %72 = dma.done.wait [#allocation2], 128 }
   0xd   :  { %73 = vsyncadd [#allocation2], 4294967168 }
   0xe   :  { %74 = dma.done.wait [#allocation2 + $0x1], 128 }
   0xf   :  { %75 = vsyncadd [#allocation2 + $0x1], 4294967168 }
  0x10   :  { %50 = vsyncmov [#allocation2] }
  0x13   :  { %s51_s27 = vpop.sfrf %50 }
  0x14   :  { %p63_p0 = scmp.ne.s32.totalorder %s51_s27, 0 }
  0x16   :  { %55 = shalt.err (%p63_p0)  }
  0x17   :  { %57 = vsyncmov [#allocation2 + $0x1] }
  0x1a   :  { %s58_s0 = vpop.sfrf %57 }
  0x1b   :  { %p64_p1 = scmp.ne.s32.totalorder %s58_s0, 0 }
  0x1d   :  { %62 = shalt.err (%p64_p1)  }

</bundles_post_ra>
